<compile_context>
chip_gen: v6e
topology: v6e:2x2x1
jax: 0.10.0
libtpu: 0.0.40
codegen_flags: <defaults>
</compile_context>

<pallas_src>
import functools

import jax
import jax.numpy as jnp
import numpy as np
from jax import lax
from jax.experimental import pallas as pl
from jax.experimental.pallas import tpu as pltpu

_LANES = 128            # vreg lane width
_MAX_BLOCK_ROWS = 4096  # rows per grid step (f32: 2 MiB per input per step)


def _l1_partial_kernel(x_ref, y_ref, o_ref, *, bm, valid_rows, needs_mask):
    """Accumulate a per-split (8,128) partial sum of |x - y| into o_ref."""
    p = pl.program_id(0)   # parallel split (megacore)
    i = pl.program_id(1)   # reduction steps within the split

    @pl.when(i == 0)
    def _init():
        o_ref[...] = jnp.zeros_like(o_ref)

    d = jnp.abs(x_ref[...].astype(jnp.float32) - y_ref[...].astype(jnp.float32))
    if needs_mask:
        # Zero rows beyond the logical extent (partial last block / phantom
        # blocks of an uneven split).  Pure VPU, hidden under the DMA.
        offset = (p * pl.num_programs(1) + i) * bm
        row_idx = lax.broadcasted_iota(jnp.int32, (bm, _LANES), 0)
        d = jnp.where(row_idx < (valid_rows - offset), d, 0.0)

    # Tree-reduce the tile to one (8,128) partial (VPU adds only; the single
    # cross-lane/sublane reduction happens once, outside the kernel).
    o_ref[...] += jnp.sum(d.reshape(bm // 8, 8, _LANES), axis=0)


@jax.jit
def l1_distance(x, y):
    """mean(|x - y|) over all elements == torch.mean(torch.abs(input - target))."""
    assert x.shape == y.shape, (x.shape, y.shape)
    total = int(np.prod(x.shape))
    if total == 0:
        return jnp.float32(0.0)

    xf = x.reshape(-1)
    yf = y.reshape(-1)

    rows = total // _LANES
    rows_main = (rows // 8) * 8          # rows the kernel handles (multiple of 8)
    main = rows_main * _LANES

    # Sub-block tail (< 8*128 + 128 elements): trivial jnp epilogue.
    tail_sum = jnp.sum(
        jnp.abs(xf[main:].astype(jnp.float32) - yf[main:].astype(jnp.float32)))

    if rows_main == 0:
        return tail_sum / total

    x2 = xf[:main].reshape(rows_main, _LANES)   # bitcast views, no HBM copies
    y2 = yf[:main].reshape(rows_main, _LANES)

    bm = min(_MAX_BLOCK_ROWS, rows_main)        # both are multiples of 8
    nblocks = -(-rows_main // bm)
    n_split = 2 if nblocks >= 2 else 1          # v7x megacore; 1 TC elsewhere
    inner = -(-nblocks // n_split)
    phantom = nblocks != n_split * inner        # uneven split -> clamped dupes
    needs_mask = phantom or (rows_main != nblocks * bm)

    if phantom:
        in_map = lambda p, i: (jnp.minimum(p * inner + i, nblocks - 1), 0)
    else:
        in_map = lambda p, i: (p * inner + i, 0)

    partials = pl.pallas_call(
        functools.partial(_l1_partial_kernel, bm=bm, valid_rows=rows_main,
                          needs_mask=needs_mask),
        grid=(n_split, inner),
        in_specs=[
            pl.BlockSpec((bm, _LANES), in_map),
            pl.BlockSpec((bm, _LANES), in_map),
        ],
        out_specs=pl.BlockSpec((8, _LANES), lambda p, i: (p, 0)),
        out_shape=jax.ShapeDtypeStruct((8 * n_split, _LANES), jnp.float32),
        compiler_params=pltpu.CompilerParams(
            dimension_semantics=("parallel", "arbitrary")),
    )(x2, y2)

    return (jnp.sum(partials) + tail_sum) / total


if __name__ == "__main__":
    key = jax.random.PRNGKey(0)

    # Shapes consistent with the module's generic forward: NCHW tensors.
    N, C, H, W = 2, 4, 16, 16
    k1, k2 = jax.random.split(key)
    inp = jax.random.normal(k1, (N, C, H, W), dtype=jnp.float32)
    tgt = jax.random.normal(k2, (N, C, H, W), dtype=jnp.float32)

    result = l1_distance(inp, tgt)
    jax.block_until_ready(result)
    ref = np.mean(np.abs(np.asarray(inp) - np.asarray(tgt)))
    assert np.allclose(np.asarray(result), ref, rtol=1e-5, atol=1e-6), (result, ref)

    # Ragged shape (exercises the jnp tail epilogue path).
    k3, k4 = jax.random.split(k2)
    a = jax.random.normal(k3, (3, 5, 7, 11), dtype=jnp.float32)
    b = jax.random.normal(k4, (3, 5, 7, 11), dtype=jnp.float32)
    r2 = l1_distance(a, b)
    jax.block_until_ready(r2)
    ref2 = np.mean(np.abs(np.asarray(a) - np.asarray(b)))
    assert np.allclose(np.asarray(r2), ref2, rtol=1e-5, atol=1e-6), (r2, ref2)

    print("KERNEL_OK")
</pallas_src>

<mosaic_0001>
module attributes {stable_mosaic.version = 11 : i64} {
  func.func @_l1_partial_kernel(%arg0: i32, %arg1: i32, %arg2: memref<16x128xf32, #tpu.memory_space<vmem>>, %arg3: memref<16x128xf32, #tpu.memory_space<vmem>>, %arg4: memref<8x128xf32, #tpu.memory_space<vmem>>) attributes {dimension_semantics = [#tpu.dimension_semantics<parallel>, #tpu.dimension_semantics<arbitrary>], iteration_bounds = array<i64: 1, 1>, scalar_prefetch = 0 : i64, scratch_operands = 0 : i64, tpu.core_type = #tpu.core_type<tc>, window_params = [{transform_indices = @transform_0, window_bounds = array<i64: 16, 128>}, {transform_indices = @transform_1, window_bounds = array<i64: 16, 128>}, {transform_indices = @transform_2, window_bounds = array<i64: 8, 128>}]} {
    %c0_i32 = arith.constant 0 : i32
    %0 = arith.cmpi eq, %arg1, %c0_i32 : i32
    %1 = arith.extui %0 : i1 to i32
    %c0_i32_0 = arith.constant 0 : i32
    %2 = arith.cmpi ne, %1, %c0_i32_0 : i32
    scf.if %2 {
      %cst_8 = arith.constant 0.000000e+00 : f32
      %12 = vector.broadcast %cst_8 : f32 to vector<8x128xf32>
      %c0_9 = arith.constant 0 : index
      %c0_10 = arith.constant 0 : index
      %13 = vector.load %arg4[%c0_9, %c0_10] : memref<8x128xf32, #tpu.memory_space<vmem>>, vector<8x128xf32>
      tpu.vector_store %arg4[%c0_9, %c0_10], %12 {strides = array<i32>} : memref<8x128xf32, #tpu.memory_space<vmem>>, vector<8x128xf32>,
    } else {
    }
    %c0 = arith.constant 0 : index
    %c0_1 = arith.constant 0 : index
    %3 = vector.load %arg2[%c0, %c0_1] : memref<16x128xf32, #tpu.memory_space<vmem>>, vector<16x128xf32>
    %c0_2 = arith.constant 0 : index
    %c0_3 = arith.constant 0 : index
    %4 = vector.load %arg3[%c0_2, %c0_3] : memref<16x128xf32, #tpu.memory_space<vmem>>, vector<16x128xf32>
    %5 = arith.subf %3, %4 : vector<16x128xf32>
    %6 = math.absf %5 : vector<16x128xf32>
    %c0_4 = arith.constant 0 : index
    %c0_5 = arith.constant 0 : index
    %7 = vector.load %arg4[%c0_4, %c0_5] : memref<8x128xf32, #tpu.memory_space<vmem>>, vector<8x128xf32>
    %8 = vector.shape_cast %6 : vector<16x128xf32> to vector<2x8x128xf32>
    %cst = arith.constant dense<0.000000e+00> : vector<8x128xf32>
    %9 = vector.multi_reduction <add>, %8, %cst [0] : vector<2x8x128xf32> to vector<8x128xf32>
    %10 = arith.addf %7, %9 : vector<8x128xf32>
    %c0_6 = arith.constant 0 : index
    %c0_7 = arith.constant 0 : index
    %11 = vector.load %arg4[%c0_6, %c0_7] : memref<8x128xf32, #tpu.memory_space<vmem>>, vector<8x128xf32>
    tpu.vector_store %arg4[%c0_6, %c0_7], %10 {strides = array<i32>} : memref<8x128xf32, #tpu.memory_space<vmem>>, vector<8x128xf32>,
    return
  }
  func.func @transform_0(%arg0: i32, %arg1: i32) -> (i32, i32) {
    %c1_i32 = arith.constant 1 : i32
    %0 = arith.muli %arg0, %c1_i32 : i32
    %1 = arith.addi %0, %arg1 : i32
    %c0_i32 = arith.constant 0 : i32
    %c0_i32_0 = arith.constant 0 : i32
    return %1, %c0_i32 : i32, i32
  }
  func.func @transform_1(%arg0: i32, %arg1: i32) -> (i32, i32) {
    %c1_i32 = arith.constant 1 : i32
    %0 = arith.muli %arg0, %c1_i32 : i32
    %1 = arith.addi %0, %arg1 : i32
    %c0_i32 = arith.constant 0 : i32
    %c0_i32_0 = arith.constant 0 : i32
    return %1, %c0_i32 : i32, i32
  }
  func.func @transform_2(%arg0: i32, %arg1: i32) -> (i32, i32) {
    %c0_i32 = arith.constant 0 : i32
    %c0_i32_0 = arith.constant 0 : i32
    return %arg0, %c0_i32 : i32, i32
  }
}

</mosaic_0001>

<bundles_post_ra>
// kernel: l1_distance.1
= control target key start
LH: loop header
LB: loop body
LE: loop exit
PB: predicated region body
PF: predicated region fallthrough
CT: control target
= control target key end

     0   :  { %s119_s0 = inlined_call_operand.vmem [shape: f32[16,128], index: 0, kind: input, shape index: {}]   ;;  %s120_s1 = inlined_call_operand.vmem [shape: f32[16,128], index: 1, kind: input, shape index: {}]   ;;  %s121_s2 = inlined_call_operand.vmem [shape: f32[8,128], index: 2, kind: output, shape index: {}]  }
   0x1   :  { %v60_v0 = vld [vmem:[%s119_s0] sm:$0xff]  ;;  %v61_v1 = vld [vmem:[%s119_s0 + $0x8] sm:$0xff] }
   0x2   :  { %v62_v2 = vld [vmem:[%s120_s1] sm:$0xff]  ;;  %v63_v3 = vld [vmem:[%s120_s1 + $0x8] sm:$0xff] }
   0x3   :  { %v64_v4 = vsub.f32 %v60_v0, %v62_v2  ;;  %v65_v5 = vsub.f32 %v61_v1, %v63_v3 }
   0x5   :  { %v66_v6 = vand.u32 2147483647, %v64_v4  ;;  %v67_v7 = vand.u32 2147483647, %v65_v5 }
   0x7   :  { %v69_v8 = vadd.f32 %v67_v7, %v66_v6 }
   0x9   :  { %71 = vst [vmem:[%s121_s2] sm:$0xff] %v69_v8 }

</bundles_post_ra>
